<compile_context>
chip_gen: v5e
topology: v5e:2x2
jax: 0.10.0
libtpu: 0.0.40
codegen_flags: <defaults>
</compile_context>

<pallas_src>
import math

import numpy as np
import jax
import jax.numpy as jnp
from jax.experimental import pallas as pl
from jax.experimental.pallas import tpu as pltpu


# ----------------------------- host-side operators ---------------------------

def _gaussian_kernel_2d(scale):
    """The exact 2-D kernel AntiAliasInterpolation2d.__init__ builds (float32)."""
    sigma = (1.0 / scale - 1.0) / 2.0
    ksize = 2 * round(sigma * 4) + 1
    ka = ksize // 2
    kb = ka - 1 if ksize % 2 == 0 else ka
    ax = np.arange(ksize, dtype=np.float32)
    mean = (ksize - 1) / 2.0
    g1 = np.exp(-((ax - mean) ** 2) / (2.0 * sigma ** 2))
    kern = np.outer(g1, g1).astype(np.float32)
    kern = kern / kern.sum()
    return kern, ka, kb


def _gaussian_1d(scale):
    """Normalized separable 1-D Gaussian (the 2-D kernel is its outer product)."""
    sigma = (1.0 / scale - 1.0) / 2.0
    ksize = 2 * round(sigma * 4) + 1
    ka = ksize // 2
    ax = np.arange(ksize, dtype=np.float64)
    mean = (ksize - 1) / 2.0
    g = np.exp(-((ax - mean) ** 2) / (2.0 * sigma ** 2))
    return g / g.sum(), ka


def _bilinear_matrix(in_size, out_size):
    """Row operator of F.interpolate(mode='bilinear', align_corners=True)."""
    L = np.zeros((out_size, in_size), dtype=np.float64)
    if out_size == 1:
        # align_corners=True with a single output row selects source index 0.
        L[0, 0] = 1.0
        return L
    for o in range(out_size):
        src = o * (in_size - 1) / (out_size - 1)
        lo = int(math.floor(src))
        hi = min(lo + 1, in_size - 1)
        frac = src - lo
        L[o, lo] += 1.0 - frac
        L[o, hi] += frac
    return L


def _fused_matrices(H, W, scale):
    """A_h (Hout,H), A_w^T (W,Wout): zero-padded Gaussian Toeplitz blur fused
    with the bilinear resize (float64; cast at the call sites)."""
    g, ka = _gaussian_1d(scale)
    ks = g.shape[0]

    def toeplitz(n):
        T = np.zeros((n, n), dtype=np.float64)
        for r in range(n):
            for t in range(ks):
                c = r + t - ka
                if 0 <= c < n:
                    T[r, c] += g[t]
        return T

    Hout = int(math.floor(H * scale))
    Wout = int(math.floor(W * scale))
    A_h = _bilinear_matrix(H, Hout) @ toeplitz(H)            # (Hout, H)
    A_wT = (_bilinear_matrix(W, Wout) @ toeplitz(W)).T       # (W, Wout)
    return A_h, A_wT, Hout, Wout


# -------------------------------- kernels ------------------------------------

def _aa_kron_kernel(x_ref, a_ref, out_ref):
    # x_ref: (1, G, H*W), a_ref: (H*W, Hout*Wout), out_ref: (1, G, Hout*Wout)
    out_ref[0] = jnp.dot(x_ref[0], a_ref[...],
                         preferred_element_type=jnp.float32).astype(out_ref.dtype)


def _aa_sep_kernel(x_ref, ah_ref, awt_ref, out_ref):
    # x_ref: (G, H, W), ah_ref: (Hout, H) f32, awt_ref: (W, Wout), out: (G, Hout, Wout)
    G, H, W = x_ref.shape
    Hout = ah_ref.shape[0]
    Wout = awt_ref.shape[1]

    # Width blur+resize: one MXU matmul with M = G*H rows.  The input stays in
    # its native dtype; accumulation is f32 via preferred_element_type.
    y = jnp.dot(x_ref[...].reshape(G * H, W), awt_ref[...],
                preferred_element_type=jnp.float32)                  # (G*H, Wout)
    y3 = y.reshape(G, H, Wout)

    # Height blur+resize: batched matmul over the plane axis.  The explicit
    # batch form is the dot_general pattern Mosaic reliably lowers; the A_h
    # broadcast it needs is accounted for in the VMEM budget when G is chosen.
    ah = jnp.broadcast_to(ah_ref[...], (G, Hout, H))
    z = jnp.einsum('goh,ghp->gop', ah, y3,
                   preferred_element_type=jnp.float32)               # (G, Hout, Wout)
    out_ref[...] = z.astype(out_ref.dtype)


# --------------------------- VMEM accounting / tiling -------------------------

def _round_up(a, m):
    return (a + m - 1) // m * m


def _padded_bytes(shape, dtype):
    """VMEM footprint of a block after (sublane, 128)-lane tile padding."""
    itemsize = jnp.dtype(dtype).itemsize
    sub = max(8, 32 // itemsize)              # 8 rows f32, 16 bf16, 32 int8
    lead = 1
    for d in shape[:-2]:
        lead *= int(d)
    return lead * _round_up(int(shape[-2]), sub) * _round_up(int(shape[-1]), 128) * itemsize


def _vmem_budget():
    """Per-chip working-set budget and the scoped-VMEM limit to request."""
    try:
        cap = int(pltpu.get_tpu_info().vmem_capacity_bytes)
    except Exception:
        cap = 64 << 20                         # conservative default (v7x per-core)
    budget = max(4 << 20, cap // 2 - (8 << 20))
    limit = min(cap - (8 << 20), budget + (16 << 20))
    return budget, limit


def _pick_block(num_planes, bytes_fn, budget):
    """Largest planes-per-step that fits the budget, then split so the grid has
    at least two steps (DMA/compute overlap; keeps both v7x TensorCores busy)."""
    g = 1
    for cand in range(2, num_planes + 1):
        if bytes_fn(cand) > budget:
            break
        g = cand
    if g >= num_planes and num_planes >= 2:
        g = -(-num_planes // 2)
    return max(1, g)


# -------------------------------- wrapper -------------------------------------

def anti_alias_interpolation2d(x, scale):
    """Pallas equivalent of AntiAliasInterpolation2d(channels=C, scale)(x)."""
    if scale == 1.0:
        return x

    B, C, H, W = x.shape
    A_h64, A_wT64, Hout, Wout = _fused_matrices(H, W, scale)
    BC = B * C
    out_dtype = x.dtype
    mat_dtype = x.dtype if jnp.dtype(x.dtype).itemsize < 4 else jnp.float32

    budget, vmem_limit = _vmem_budget()
    cparams = pltpu.CompilerParams(dimension_semantics=("parallel",),
                                   vmem_limit_bytes=int(vmem_limit))

    HW, HWout = H * W, Hout * Wout
    use_kron = (HW <= 64 * 64) and (HW * HWout * 4 <= (8 << 20))

    if use_kron:
        # ---------- small-image fast path: one fused-operator matmul ----------
        A_kT = jnp.asarray(np.kron(A_h64.T, A_wT64), dtype=mat_dtype)  # (HW, HWout)

        def kron_bytes(g):
            return (2 * _padded_bytes((g, HW), x.dtype)
                    + 2 * _padded_bytes((g, HWout), out_dtype)
                    + 2 * _padded_bytes((HW, HWout), mat_dtype)
                    + _padded_bytes((g, HWout), jnp.float32)
                    + (1 << 20))

        g_blk = _pick_block(BC, kron_bytes, budget)
        nb = -(-BC // g_blk)
        BC_p = nb * g_blk

        x2 = x.reshape(BC, HW)
        if BC_p != BC:
            x2 = jnp.pad(x2, ((0, BC_p - BC), (0, 0)))
        x3 = x2.reshape(nb, g_blk, HW)

        out = pl.pallas_call(
            _aa_kron_kernel,
            out_shape=jax.ShapeDtypeStruct((nb, g_blk, HWout), out_dtype),
            grid_spec=pltpu.PrefetchScalarGridSpec(
                num_scalar_prefetch=0,
                grid=(nb,),
                in_specs=[
                    pl.BlockSpec((1, g_blk, HW), lambda g: (g, 0, 0)),
                    pl.BlockSpec((HW, HWout), lambda g: (0, 0)),
                ],
                out_specs=pl.BlockSpec((1, g_blk, HWout), lambda g: (g, 0, 0)),
            ),
            compiler_params=cparams,
        )(x3, A_kT)

        return out.reshape(BC_p, HWout)[:BC].reshape(B, C, Hout, Wout)

    # ------------- general path: separable width- then height-stage ----------
    A_h = jnp.asarray(A_h64, dtype=jnp.float32)   # height-stage rhs is f32 anyway
    A_wT = jnp.asarray(A_wT64, dtype=mat_dtype)

    def sep_bytes(g):
        return (2 * _padded_bytes((g, H, W), x.dtype)              # input (dbl-buf)
                + 2 * _padded_bytes((g, Hout, Wout), out_dtype)    # output (dbl-buf)
                + _padded_bytes((g * H, Wout), jnp.float32)        # width-stage result
                + _padded_bytes((g, Hout, H), jnp.float32)         # broadcast A_h
                + _padded_bytes((g, Hout, Wout), jnp.float32)      # height-stage result
                + 2 * (_padded_bytes((Hout, H), jnp.float32)
                       + _padded_bytes((W, Wout), mat_dtype))      # operator matrices
                + (1 << 20))

    g_blk = _pick_block(BC, sep_bytes, budget)
    nb = -(-BC // g_blk)
    BC_p = nb * g_blk

    x3 = x.reshape(BC, H, W)
    if BC_p != BC:
        x3 = jnp.pad(x3, ((0, BC_p - BC), (0, 0), (0, 0)))

    out = pl.pallas_call(
        _aa_sep_kernel,
        out_shape=jax.ShapeDtypeStruct((BC_p, Hout, Wout), out_dtype),
        grid_spec=pltpu.PrefetchScalarGridSpec(
            num_scalar_prefetch=0,
            grid=(nb,),
            in_specs=[
                pl.BlockSpec((g_blk, H, W), lambda g: (g, 0, 0)),
                pl.BlockSpec((Hout, H), lambda g: (0, 0)),
                pl.BlockSpec((W, Wout), lambda g: (0, 0)),
            ],
            out_specs=pl.BlockSpec((g_blk, Hout, Wout), lambda g: (g, 0, 0)),
        ),
        compiler_params=cparams,
    )(x3, A_h, A_wT)

    return out[:BC].reshape(B, C, Hout, Wout)


# ------------------------------ pure-JAX reference ----------------------------

def _reference(x, scale):
    """Independent reference: explicit padded depthwise blur + bilinear matrices."""
    if scale == 1.0:
        return x
    B, C, H, W = x.shape
    gauss, ka, kb = _gaussian_kernel_2d(scale)
    xp = jnp.pad(x.astype(jnp.float32), ((0, 0), (0, 0), (ka, kb), (ka, kb)))
    k = gauss.shape[0]
    acc = jnp.zeros((B, C, H, W), jnp.float32)
    for i in range(k):
        for j in range(k):
            acc = acc + float(gauss[i, j]) * xp[:, :, i:i + H, j:j + W]
    Hout = int(math.floor(H * scale))
    Wout = int(math.floor(W * scale))
    Lh = jnp.asarray(_bilinear_matrix(H, Hout), jnp.float32)
    Lw = jnp.asarray(_bilinear_matrix(W, Wout), jnp.float32)
    return jnp.einsum('oh,bchw,pw->bcop', Lh, acc, Lw).astype(x.dtype)


# ----------------------------------- main ------------------------------------

if __name__ == "__main__":
    k1, k2 = jax.random.split(jax.random.PRNGKey(0))

    # Case 1: small image -> Kronecker fast path (single fused matmul).
    x1 = jax.random.normal(k1, (2, 4, 16, 16), dtype=jnp.float32)
    out1 = jax.block_until_ready(anti_alias_interpolation2d(x1, 0.5))
    ref1 = jax.block_until_ready(_reference(x1, 0.5))
    assert out1.shape == (2, 4, 8, 8), out1.shape
    np.testing.assert_allclose(np.asarray(out1), np.asarray(ref1),
                               rtol=1e-4, atol=1e-4)

    # Case 2: larger image -> separable two-matmul path (exercises plane padding).
    x2 = jax.random.normal(k2, (1, 3, 80, 80), dtype=jnp.float32)
    out2 = jax.block_until_ready(anti_alias_interpolation2d(x2, 0.5))
    ref2 = jax.block_until_ready(_reference(x2, 0.5))
    assert out2.shape == (1, 3, 40, 40), out2.shape
    np.testing.assert_allclose(np.asarray(out2), np.asarray(ref2),
                               rtol=1e-4, atol=1e-4)

    print("KERNEL_OK")
</pallas_src>

<mosaic_0001>
module attributes {stable_mosaic.version = 11 : i64} {
  func.func @_aa_kron_kernel(%arg0: i32, %arg1: memref<1x4x256xf32, #tpu.memory_space<vmem>>, %arg2: memref<256x64xf32, #tpu.memory_space<vmem>>, %arg3: memref<1x4x64xf32, #tpu.memory_space<vmem>>) attributes {dimension_semantics = [#tpu.dimension_semantics<parallel>], iteration_bounds = array<i64: 2>, scalar_prefetch = 0 : i64, scratch_operands = 0 : i64, tpu.core_type = #tpu.core_type<tc>, window_params = [{transform_indices = @transform_0, window_bounds = array<i64: 1, 4, 256>}, {pipeline_mode = #tpu.pipeline_mode<synchronous>, transform_indices = @transform_1, window_bounds = array<i64: 256, 64>}, {transform_indices = @transform_2, window_bounds = array<i64: 1, 4, 64>}]} {
    %c0 = arith.constant 0 : index
    %c0_0 = arith.constant 0 : index
    %c0_1 = arith.constant 0 : index
    %0 = vector.load %arg1[%c0, %c0_0, %c0_1] : memref<1x4x256xf32, #tpu.memory_space<vmem>>, vector<1x4x256xf32>
    %1 = vector.shape_cast %0 : vector<1x4x256xf32> to vector<4x256xf32>
    %c0_2 = arith.constant 0 : index
    %c0_3 = arith.constant 0 : index
    %2 = vector.load %arg2[%c0_2, %c0_3] : memref<256x64xf32, #tpu.memory_space<vmem>>, vector<256x64xf32>
    %cst = arith.constant dense<0.000000e+00> : vector<4x64xf32>
    %3 = tpu.matmul %1, %2, %cst {dimension_numbers = #tpu.dot_dimension_numbers<[1], [0], [0], [1], [0, 0, 1, 1], [], []>} : vector<4x256xf32>, vector<256x64xf32>, vector<4x64xf32> -> vector<4x64xf32>
    %c0_4 = arith.constant 0 : index
    %c0_5 = arith.constant 0 : index
    %c0_6 = arith.constant 0 : index
    %4 = vector.load %arg3[%c0_4, %c0_5, %c0_6] : memref<1x4x64xf32, #tpu.memory_space<vmem>>, vector<1x4x64xf32>
    %5 = vector.shape_cast %4 : vector<1x4x64xf32> to vector<4x64xf32>
    %6 = vector.shape_cast %3 : vector<4x64xf32> to vector<1x4x64xf32>
    tpu.vector_store %arg3[%c0_4, %c0_5, %c0_6], %6 {strides = array<i32>} : memref<1x4x64xf32, #tpu.memory_space<vmem>>, vector<1x4x64xf32>,
    return
  }
  func.func @transform_0(%arg0: i32) -> (i32, i32, i32) {
    %c0_i32 = arith.constant 0 : i32
    %c0_i32_0 = arith.constant 0 : i32
    %c0_i32_1 = arith.constant 0 : i32
    return %arg0, %c0_i32, %c0_i32_0 : i32, i32, i32
  }
  func.func @transform_1(%arg0: i32) -> (i32, i32) {
    %c0_i32 = arith.constant 0 : i32
    %c0_i32_0 = arith.constant 0 : i32
    %c0_i32_1 = arith.constant 0 : i32
    return %c0_i32, %c0_i32_0 : i32, i32
  }
  func.func @transform_2(%arg0: i32) -> (i32, i32, i32) {
    %c0_i32 = arith.constant 0 : i32
    %c0_i32_0 = arith.constant 0 : i32
    %c0_i32_1 = arith.constant 0 : i32
    return %arg0, %c0_i32, %c0_i32_0 : i32, i32, i32
  }
}

</mosaic_0001>

<bundles_post_ra>
// kernel: tpu_custom_call.1
= control target key start
LH: loop header
LB: loop body
LE: loop exit
PB: predicated region body
PF: predicated region fallthrough
CT: control target
= control target key end

     0   :  { %7 = vsyncpa [#allocation3], 0  ;;  %s609_s0 = inlined_call_operand.vmem [shape: f32[2,4,256], index: 0, kind: input, shape index: {}]   ;;  %s610_s1 = inlined_call_operand.vmem [shape: f32[256,64], index: 1, kind: input, shape index: {}]   ;;  %s611_s2 = inlined_call_operand.hbm [shape: f32[2,4,64], index: 2, kind: output, shape index: {}]  }
   0x1   :  { %9 = vsyncpa [#allocation3 + $0x1], 0  ;;  %s428_s9 = smov 0   ;;  %s430_s10 = smov 0  }
   0x2   :  { %s432_s11 = smov 0   ;;  %s434_s12 = smov 0  }
   0x3 LB: > { %s449_s13 = sadd.s32 4294967295, %s411_s12   ;;  %s298_s14 = sadd.s32 4294967294, %s411_s12   ;;  %s411_s12 = sphi %s434_s12, %s617_s12   ;;  %s407_s11 = sphi %s432_s11, %s616_s11   ;;  %s403_s10 = sphi %s430_s10, %s615_s10   ;;  %s399_s9 = sphi %s428_s9, %s614_s9  }
   0x4   : > { %s453_s15 = sadd.s32 1, %s411_s12   ;;  %s69_s16 = sadd.s32 1, %s407_s11 }
   0x5   : > { %s66_s17 = ssub.s32 %s411_s12, %s453_s15  ;;  %p79_p0 = scmp.ne.s32.totalorder %s407_s11, %s403_s10 }
   0x6   : > { %p67_p1 = scmp.eq.s32.totalorder %s66_s17, 0  ;;  %p80_p2 = scmp.eq.s32.totalorder %s449_s13, 1 }
   0x7   : > { %p85_p3 = scmp.ne.s32.totalorder %s403_s10, %s399_s9  ;;  %p86_p4 = scmp.eq.s32.totalorder %s298_s14, 1 }
   0x8   : > { %s464_s18 = scalar_select %p67_p1, %s407_s11, %s69_s16  }
   0x9   : > { %p466_p5 = por %p80_p2, %p79_p0  ;;  %p470_p6 = por %p86_p4, %p85_p3 }
   0xa   : > { %p301_p7 = scmp.ge.s32.totalorder %s411_s12, 1  ;;  %p115_p8 = scmp.lt.s32.totalorder %s411_s12, 3 }
   0xc   : > { %p116_p9 = pnand %p301_p7, %p115_p8 }
   0xd   : > { %p137_p10 = scmp.lt.s32.totalorder (!%p116_p9), %s449_s13, 1  ;;  %s306_s7 = sshll.u32 (!%p116_p9), %s449_s13, 2 }
   0xe   : > { %119 = sbr.rel (%p116_p9) target bundleno = 183 (0xb7), region = 28  ;;  %s369_s27 = scalar_lea.hbm (!%p116_p9), %s611_s2, 8 }
  0x13   : > { %v158_v0 = vld [vmem:[%s610_s1 + $0x78] sm:$0xff]  ;;  %v157_v2 = vld [vmem:[%s610_s1 + $0x70] sm:$0xff]  ;;  %v156_v4 = vld [vmem:[%s610_s1 + $0x68] sm:$0xff]  ;;  %s138_s5 = scalar_select %p137_p10, %s449_s13, 1  ;;  %vm221_vm0 = vcmask 519168  }
  0x14   : > { %v174_v1 = vld [vmem:[%s610_s1 + $0xf8] sm:$0xff]  ;;  %181 = vmatpush.msra.mxu0 %v158_v0  ;;  %v173_v3 = vld [vmem:[%s610_s1 + $0xf0] sm:$0xff]  ;;  %v172_v5 = vld [vmem:[%s610_s1 + $0xe8] sm:$0xff] }
  0x15   : > { %201 = vmatpush.msra.mxu1 %v174_v1  ;;  %v155_v6 = vld [vmem:[%s610_s1 + $0x60] sm:$0xff]  ;;  %s309_s16 = sshll.u32 %s138_s5, 3  ;;  %v154_v8 = vld [vmem:[%s610_s1 + $0x58] sm:$0xff]  ;;  %v153_v10 = vld [vmem:[%s610_s1 + $0x50] sm:$0xff]  ;;  %s134_s5 = sand.u32 1, %s403_s10  }
  0x16   : > { %182 = vmatpush.msra.mxu0 %v157_v2  ;;  %v171_v7 = vld [vmem:[%s610_s1 + $0xe0] sm:$0xff]  ;;  %v170_v9 = vld [vmem:[%s610_s1 + $0xd8] sm:$0xff]  ;;  %s141_s26 = scalar_lea.vmem %s609_s0, %s309_s16  ;;  %v169_v11 = vld [vmem:[%s610_s1 + $0xd0] sm:$0xff]  ;;  %s302_s6 = sshll.u32 %s134_s5, 2 }
  0x17   : > { %202 = vmatpush.msra.mxu1 %v173_v3  ;;  %v152_v12 = vld [vmem:[%s610_s1 + $0x48] sm:$0xff]  ;;  %v142_v14 = vld [vmem:[%s141_s26] sm:$0xff]  ;;  %v150_v17 = vld [vmem:[%s610_s1 + $0x38] sm:$0xff]  ;;  %s234_s16 = scalar_lea.hbm %s611_s2, %s306_s7  ;;  %s136_s17 = scalar_lea.vmem [#allocation2], %s302_s6 }
  0x18   : > { %183 = vmatpush.msra.mxu0 %v156_v4  ;;  %v168_v13 = vld [vmem:[%s610_s1 + $0xc8] sm:$0xff]  ;;  %176 = vst [vmem:[#allocation1] ss:$2 sm:$0xff] %v142_v14  ;;  %v151_v15 = vld [vmem:[%s610_s1 + $0x40] sm:$0xff]  ;;  %v166_v18 = vld [vmem:[%s610_s1 + $0xb8] sm:$0xff]  ;;  %s236_s21 = sshll.u32 %s136_s17, 4  ;;  %s237_s21 = int_to_ptr.vmem [resolvable:$true] %s236_s21 }
  0x19   : > { %203 = vmatpush.msra.mxu1 %v172_v5  ;;  %v167_v16 = vld [vmem:[%s610_s1 + $0xc0] sm:$0xff]  ;;  %v149_v19 = vld [vmem:[%s610_s1 + $0x30] sm:$0xff]  ;;  %v148_v21 = vld [vmem:[%s610_s1 + $0x28] sm:$0xff]  ;;  %s238_s22 = sshll.u32 %s234_s16, 4  ;;  %s224_s23 = scalar_lea.sflag [#allocation3], %s134_s5  ;;  %s239_s22 = int_to_ptr.hbm [resolvable:$true] %s238_s22 }
  0x1a   : > { %184 = vmatpush.msra.mxu0 %v155_v6  ;;  %v165_v20 = vld [vmem:[%s610_s1 + $0xb0] sm:$0xff]  ;;  %v164_v22 = vld [vmem:[%s610_s1 + $0xa8] sm:$0xff]  ;;  %v147_v23 = vld [vmem:[%s610_s1 + $0x20] sm:$0xff]  ;;  %s363_s24 = sshra.s32 %s239_s22, 4  ;;  %s364_s24 = int_to_ptr.hbm [resolvable:$true] %s363_s24 }
  0x1b   : > { %204 = vmatpush.msra.mxu1 %v171_v7  ;;  %v163_v24 = vld [vmem:[%s610_s1 + $0xa0] sm:$0xff]  ;;  %v146_v25 = vld [vmem:[%s610_s1 + $0x18] sm:$0xff]  ;;  %v145_v27 = vld [vmem:[%s610_s1 + $0x10] sm:$0xff]  ;;  %s365_s25 = scalar_lea.hbm %s364_s24, 4  ;;  %p370_p0 = scmp.lt.s32.totalorder %s364_s24, %s611_s2 }
  0x1c   : > { %185 = vmatpush.msra.mxu0 %v154_v8  ;;  %v162_v26 = vld [vmem:[%s610_s1 + $0x98] sm:$0xff]  ;;  %v161_v28 = vld [vmem:[%s610_s1 + $0x90] sm:$0xff]  ;;  %v144_v29 = vld [vmem:[%s610_s1 + $0x8] sm:$0xff]  ;;  %p366_p11 = scmp.ne.s32.totalorder %s364_s24, %s365_s25  ;;  %p371_p1 = scmp.lt.s32.totalorder %s369_s27, %s365_s25 }
  0x1d   : > { %205 = vmatpush.msra.mxu1 %v170_v9  ;;  %v160_v30 = vld [vmem:[%s610_s1 + $0x88] sm:$0xff]  ;;  %v143_v31 = vld [vmem:[%s610_s1] sm:$0xff] }
  0x1e   : > { %186 = vmatpush.msra.mxu0 %v153_v10  ;;  %v159_v32 = vld [vmem:[%s610_s1 + $0x80] sm:$0xff]  ;;  %p367_p12 = pnand %p366_p11, %p466_p5  ;;  %p372_p2 = por %p371_p1, %p370_p0 }
  0x1f   : > { %206 = vmatpush.msra.mxu1 %v169_v11  ;;  %v177_v33 = vld.sshfl [vmem:[#allocation1] sm:$0xff pattern:$0x75316420]  ;;  %v178_v34 = vld.sshfl [vmem:[#allocation1 + $0x8] sm:$0xff pattern:$0x75316420] }
  0x20   : > { %187 = vmatpush.msra.mxu0 %v152_v12  ;;  %p368_p13 = pneg %p367_p12 }
  0x21   : > { %207 = vmatpush.msra.mxu1 %v168_v13 }
  0x22   : > { %188 = vmatpush.msra.mxu0 %v151_v15  ;;  %p373_p3 = pnand %p372_p2, %p368_p13 }
  0x23   : > { %208 = vmatpush.msra.mxu1 %v167_v16 }
  0x24   : > { %189 = vmatpush.msra.mxu0 %v150_v17 }
  0x25   : > { %209 = vmatpush.msra.mxu1 %v166_v18 }
  0x26   : > { %190 = vmatpush.msra.mxu0 %v149_v19 }
  0x27   : > { %210 = vmatpush.msra.mxu1 %v165_v20 }
  0x28   : > { %191 = vmatpush.msra.mxu0 %v148_v21 }
  0x29   : > { %211 = vmatpush.msra.mxu1 %v164_v22 }
  0x2a   : > { %192 = vmatpush.msra.mxu0 %v147_v23 }
  0x2b   : > { %212 = vmatpush.msra.mxu1 %v163_v24 }
  0x2c   : > { %193 = vmatpush.msra.mxu0 %v146_v25 }
  0x2d   : > { %213 = vmatpush.msra.mxu1 %v162_v26 }
  0x2e   : > { %194 = vmatpush.msra.mxu0 %v145_v27 }
  0x2f   : > { %214 = vmatpush.msra.mxu1 %v161_v28 }
  0x30   : > { %195 = vmatpush.msra.mxu0 %v144_v29 }
  0x31   : > { %215 = vmatpush.msra.mxu1 %v160_v30 }
  0x32   : > { %196 = vmatpush.msra.mxu0 %v143_v31 }
  0x33   : > { %216 = vmatpush.msra.mxu1 %v159_v32  ;;  %197 = vmatmul.f32.vlgmr.msra.gmra.mxu0 %v177_v33 }
  0x34   : > { %217 = vmatmul.f32.vlgmr.msra.gmra.mxu1 %v178_v34 }
  0xb0   : > { %v198_v35 = vpop.f32.mrf.mxu0 }
  0xb1   : > { %v218_v36 = vpop.f32.mrf.mxu1 }
  0xb2   : > { %v219_v37 = vadd.f32 %v218_v36, %v198_v35 }
  0xb4   : > { %222 = vst.msk [vmem:[%s136_s17] sm:$0xf] %vm221_vm0, %v219_v37 }
  0xb5   : > { %376 = shalt.err (!%p373_p3)
}
  0xb6   : > { %310 = dma.vmem_to_hbm [thread:$0]  (%p466_p5), %s237_s21, 64, %s239_s22, %s224_s23  }
  0xb7 PF: > { %p316_p4 = scmp.ge.s32.totalorder %s411_s12, 2  ;;  %s250_s30 = sand.u32 1, %s399_s9  }
  0xb8   : > { %s251_s3 = scalar_lea.sflag [#allocation3], %s250_s30 }
  0xb9   : > { %p313_p7 = pnand %p316_p4, %p470_p6 }
  0xbb   : > { %p314_p8 = pneg %p313_p7 }
  0xbd   : > { %394 = dma.done.wait (%p314_p8), %s251_s3, 64  }
  0xbe   : > { %396 = vsyncadd (%p314_p8), %s251_s3, 4294967232  ;;  %p12_p9 = scmp.ge.s32.totalorder %s453_s15, 4   ;;  %s614_s9 = smov %s403_s10 }
  0xbf   : > { %s615_s10 = smov %s407_s11  ;;  %s616_s11 = smov %s464_s18 }
  0xc0   : > { %s617_s12 = smov %s453_s15  ;;  %14 = sbr.rel (!%p12_p9) target bundleno = 3 (0x3), region = 63 }
  0xc5   :  { %257 = vsyncpa [#allocation3], 1 }
  0xc6   :  { %259 = vsyncpa [#allocation3 + $0x1], 1 }

</bundles_post_ra>
